<compile_context>
chip_gen: v7x
topology: tpu7x:2x2x1
jax: 0.10.0
libtpu: 0.0.40
codegen_flags: <defaults>
</compile_context>

<pallas_src>
import jax
import jax.numpy as jnp
from jax.experimental import pallas as pl
from jax.experimental.pallas import tpu as pltpu


def _make_gc_kernel(hw_actual, hw_padded):
    """Builds the GC kernel; hw_actual / hw_padded are static (closure) ints."""
    needs_mask = hw_padded != hw_actual

    def kernel(x_ref, wk_ref, w1_ref, b1_ref, g_ref, be_ref, w2_ref, b2_ref,
               out_ref):
        x = x_ref[...].astype(jnp.float32)                        # (Bt, C, HWp)

        # --- 1x1 conv over channels -> spatial logits -----------------------
        # VPU multiply + sublane (channel) reduction; x stays in its natural
        # layout, no MXU weight loads for a single useful output row.
        # The conv bias is omitted: softmax is invariant to a constant shift.
        wk = wk_ref[...].astype(jnp.float32)                      # (1, C)
        logits = jnp.sum(x * wk[:, :, None], axis=1, keepdims=True)  # (Bt,1,HWp)

        if needs_mask:
            # Padded lanes must not contribute to the softmax denominator.
            lane = jax.lax.broadcasted_iota(jnp.int32, logits.shape, 2)
            logits = jnp.where(lane < hw_actual, logits, -jnp.inf)

        # --- softmax folded into the context reduction ----------------------
        # Normalize the (Bt, C) context once instead of dividing the HW-wide
        # weight stream: Bt*HW divides -> Bt*C multiplies.
        m = jnp.max(logits, axis=-1, keepdims=True)
        e = jnp.exp(logits - m)                                   # 0 on padded lanes
        denom = jnp.sum(e, axis=-1)                               # (Bt, 1)
        ctx = jnp.sum(x * e, axis=-1)                             # (Bt, C) lane-reduce
        # approx=False keeps numerics tight vs. the reference; the structural
        # win (no HW-wide divide pass) is already captured.
        ctx = ctx * pl.reciprocal(denom, approx=False)

        # --- transform: Linear -> LayerNorm -> ReLU -> Linear ----------------
        h = jnp.dot(ctx, w1_ref[...].astype(jnp.float32),
                    preferred_element_type=jnp.float32)
        h = h + b1_ref[...].astype(jnp.float32)
        mu = jnp.mean(h, axis=-1, keepdims=True)
        var = jnp.mean((h - mu) ** 2, axis=-1, keepdims=True)
        hn = (h - mu) * jax.lax.rsqrt(var + 1e-5)
        hn = hn * g_ref[...].astype(jnp.float32) + be_ref[...].astype(jnp.float32)
        hn = jnp.maximum(hn, 0.0)
        gc = jnp.dot(hn, w2_ref[...].astype(jnp.float32),
                     preferred_element_type=jnp.float32)
        gc = gc + b2_ref[...].astype(jnp.float32)                 # (Bt, C)

        # --- residual: tiny (Bt*C) column relayout, then a VPU broadcast-add
        #     over the spatial lanes and a lane-dense store --------------------
        out_ref[...] = (x + gc[:, :, None]).astype(out_ref.dtype)

    return kernel


def _gc_block_impl(x_nchw, params):
    """x_nchw: (B, C, H, W). params: dict of weights (see init_params)."""
    B, C, H, W = x_nchw.shape
    HW = H * W
    hw_pad = ((HW + 127) // 128) * 128            # lane-dense last dim
    x = x_nchw.reshape(B, C, HW)
    if hw_pad != HW:
        x = jnp.pad(x, ((0, 0), (0, 0), (0, hw_pad - HW)))

    itemsize = jnp.dtype(x.dtype).itemsize
    bytes_per_batch = C * hw_pad * itemsize

    # ---- generation-aware block / VMEM budget -------------------------------
    try:
        vmem_capacity = int(pltpu.get_tpu_info().vmem_capacity_bytes)
    except Exception:
        vmem_capacity = 128 << 20
    # v7x: 64 MiB per TC -> small blocks; v5e/v6e: 128 MiB -> bigger blocks
    # amortize the ~0.35us per-grid-step overhead.
    block_target = (4 << 20) if vmem_capacity <= (64 << 20) else (12 << 20)

    # ---- batch elements per grid step ---------------------------------------
    bt = max(1, block_target // max(bytes_per_batch, 1))
    # Never collapse the grid: >=4 steps keeps prefetch/compute/writeback
    # overlapped; >=2 steps keeps both v7x TensorCores busy ("parallel" axis).
    if B >= 4:
        bt = min(bt, B // 4)
    elif B >= 2:
        bt = min(bt, B // 2)
    bt = max(1, min(bt, B))
    while B % bt:                                  # exact tiling of B
        bt -= 1
    block_bytes = bt * bytes_per_batch

    # Double-buffered input + output blocks + params/headroom, capped to 75%
    # of this generation's physical VMEM.
    vmem_limit = 4 * block_bytes + (8 << 20)
    vmem_limit = int(max(32 << 20, min(vmem_limit, (vmem_capacity * 3) // 4)))
    # TODO(synk): if a single batch's (C, HW) block no longer fits this budget
    # (huge activations, esp. v7x's 64 MiB VMEM), add an inner "arbitrary" HW
    # grid axis with an online-softmax pass (running max / denom / rescaled
    # ctx accumulator in VMEM scratch) plus a second pass for the residual add.

    grid = (B // bt,)

    def _param_spec(a):
        return pl.BlockSpec(a.shape, lambda b, nd=a.ndim: (0,) * nd)

    kernel = _make_gc_kernel(HW, hw_pad)

    out = pl.pallas_call(
        kernel,
        out_shape=jax.ShapeDtypeStruct((B, C, hw_pad), x.dtype),
        grid=grid,
        in_specs=[
            pl.BlockSpec((bt, C, hw_pad), lambda b: (b, 0, 0)),   # x
            _param_spec(params["wk"]),                            # (1, C)
            _param_spec(params["w1"]),                            # (C, Cb)
            _param_spec(params["b1"]),                            # (1, Cb)
            _param_spec(params["ln_g"]),                          # (1, Cb)
            _param_spec(params["ln_b"]),                          # (1, Cb)
            _param_spec(params["w2"]),                            # (Cb, C)
            _param_spec(params["b2"]),                            # (1, C)
        ],
        out_specs=pl.BlockSpec((bt, C, hw_pad), lambda b: (b, 0, 0)),
        input_output_aliases={0: 0},       # out = x + broadcast(gc): in place
        compiler_params=pltpu.CompilerParams(
            dimension_semantics=("parallel",),
            vmem_limit_bytes=vmem_limit),
    )(x, params["wk"], params["w1"], params["b1"],
      params["ln_g"], params["ln_b"], params["w2"], params["b2"])

    if hw_pad != HW:
        out = out[:, :, :HW]
    return out.reshape(B, C, H, W)


# Donating x makes the in-place alias real (no defensive copy of x); the
# caller must not reuse x after the call.
gc_block = jax.jit(_gc_block_impl, donate_argnums=0)


def init_params(key, C, bottleneck_ratio=0.25):
    Cb = int(C * bottleneck_ratio)
    ks = jax.random.split(key, 6)
    return {
        # Conv2d(C, 1, 1): weight (1, C, 1, 1) stored as (1, C), bias (1,).
        # The kernel never reads bk (softmax shift invariance); the reference
        # does, which demonstrates the equivalence.
        "wk": jax.random.normal(ks[0], (1, C), jnp.float32) * 0.1,
        "bk": jnp.full((1,), 0.25, jnp.float32),
        # Linear(C, Cb): stored transposed as (C, Cb) so y = x @ W + b
        "w1": jax.random.normal(ks[1], (C, Cb), jnp.float32) * 0.1,
        "b1": jax.random.normal(ks[2], (1, Cb), jnp.float32) * 0.01,
        # LayerNorm(Cb)
        "ln_g": jnp.ones((1, Cb), jnp.float32),
        "ln_b": jnp.zeros((1, Cb), jnp.float32),
        # Linear(Cb, C): stored transposed as (Cb, C)
        "w2": jax.random.normal(ks[3], (Cb, C), jnp.float32) * 0.1,
        "b2": jax.random.normal(ks[4], (1, C), jnp.float32) * 0.01,
    }


def gc_block_ref(x, p):
    """Pure-JAX reference (faithful to the PyTorch module, incl. conv bias)."""
    B, C, H, W = x.shape
    xf = x.reshape(B, C, H * W)
    logits = jnp.einsum("bci,kc->bki", xf, p["wk"]) + p["bk"][0]      # (B,1,HW)
    w = jax.nn.softmax(logits.reshape(B, -1), axis=1)                 # (B,HW)
    ctx = jnp.sum(xf * w[:, None, :], axis=-1)                        # (B,C)
    h = ctx @ p["w1"] + p["b1"]
    mu = h.mean(-1, keepdims=True)
    var = ((h - mu) ** 2).mean(-1, keepdims=True)
    hn = (h - mu) / jnp.sqrt(var + 1e-5) * p["ln_g"] + p["ln_b"]
    hn = jnp.maximum(hn, 0.0)
    gc = hn @ p["w2"] + p["b2"]                                       # (B,C)
    return x + gc[:, :, None, None]


if __name__ == "__main__":
    key = jax.random.PRNGKey(0)
    k_x, k_p = jax.random.split(key)

    B, C, H, W = 4, 16, 16, 16            # Cb = int(16 * 0.25) = 4, HW = 256
    x = jax.random.normal(k_x, (B, C, H, W), jnp.float32)
    params = init_params(k_p, C)

    ref = gc_block_ref(x, params)         # compute BEFORE x is donated
    out = gc_block(x, params)
    jax.block_until_ready(out)

    assert out.shape == (B, C, H, W)
    assert jnp.allclose(out, ref, atol=1e-3, rtol=1e-3), "mismatch vs reference"

    print("KERNEL_OK")
</pallas_src>

<mosaic_0001>
module attributes {stable_mosaic.version = 11 : i64} {
  func.func @kernel(%arg0: i32, %arg1: memref<1x16x256xf32, #tpu.memory_space<vmem>>, %arg2: memref<1x16xf32, #tpu.memory_space<vmem>>, %arg3: memref<16x4xf32, #tpu.memory_space<vmem>>, %arg4: memref<1x4xf32, #tpu.memory_space<vmem>>, %arg5: memref<1x4xf32, #tpu.memory_space<vmem>>, %arg6: memref<1x4xf32, #tpu.memory_space<vmem>>, %arg7: memref<4x16xf32, #tpu.memory_space<vmem>>, %arg8: memref<1x16xf32, #tpu.memory_space<vmem>>, %arg9: memref<1x16x256xf32, #tpu.memory_space<vmem>>) attributes {dimension_semantics = [#tpu.dimension_semantics<parallel>], iteration_bounds = array<i64: 4>, scalar_prefetch = 0 : i64, scratch_operands = 0 : i64, tpu.core_type = #tpu.core_type<tc>, window_params = [{transform_indices = @transform_0, window_bounds = array<i64: 1, 16, 256>}, {pipeline_mode = #tpu.pipeline_mode<synchronous>, transform_indices = @transform_1, window_bounds = array<i64: 1, 16>}, {pipeline_mode = #tpu.pipeline_mode<synchronous>, transform_indices = @transform_2, window_bounds = array<i64: 16, 4>}, {pipeline_mode = #tpu.pipeline_mode<synchronous>, transform_indices = @transform_3, window_bounds = array<i64: 1, 4>}, {pipeline_mode = #tpu.pipeline_mode<synchronous>, transform_indices = @transform_4, window_bounds = array<i64: 1, 4>}, {pipeline_mode = #tpu.pipeline_mode<synchronous>, transform_indices = @transform_5, window_bounds = array<i64: 1, 4>}, {pipeline_mode = #tpu.pipeline_mode<synchronous>, transform_indices = @transform_6, window_bounds = array<i64: 4, 16>}, {pipeline_mode = #tpu.pipeline_mode<synchronous>, transform_indices = @transform_7, window_bounds = array<i64: 1, 16>}, {transform_indices = @transform_8, window_bounds = array<i64: 1, 16, 256>}]} {
    %c0 = arith.constant 0 : index
    %c0_0 = arith.constant 0 : index
    %c0_1 = arith.constant 0 : index
    %0 = vector.load %arg1[%c0, %c0_0, %c0_1] : memref<1x16x256xf32, #tpu.memory_space<vmem>>, vector<1x16x256xf32>
    %c0_2 = arith.constant 0 : index
    %c0_3 = arith.constant 0 : index
    %1 = vector.load %arg2[%c0_2, %c0_3] : memref<1x16xf32, #tpu.memory_space<vmem>>, vector<1x16xf32>
    %2 = vector.shape_cast %1 : vector<1x16xf32> to vector<1x16x1xf32>
    %3 = vector.broadcast %2 : vector<1x16x1xf32> to vector<1x16x256xf32>
    %4 = arith.mulf %0, %3 : vector<1x16x256xf32>
    %cst = arith.constant dense<0.000000e+00> : vector<1x256xf32>
    %5 = vector.multi_reduction <add>, %4, %cst [1] : vector<1x16x256xf32> to vector<1x256xf32>
    %6 = vector.shape_cast %5 : vector<1x256xf32> to vector<1x1x256xf32>
    %cst_4 = arith.constant dense<0xFF800000> : vector<1x1xf32>
    %7 = vector.multi_reduction <maximumf>, %6, %cst_4 [2] : vector<1x1x256xf32> to vector<1x1xf32>
    %8 = vector.shape_cast %7 : vector<1x1xf32> to vector<1x1x1xf32>
    %9 = vector.broadcast %8 : vector<1x1x1xf32> to vector<1x1x256xf32>
    %10 = arith.subf %6, %9 : vector<1x1x256xf32>
    %11 = math.exp %10 : vector<1x1x256xf32>
    %cst_5 = arith.constant dense<0.000000e+00> : vector<1x1xf32>
    %12 = vector.multi_reduction <add>, %11, %cst_5 [2] : vector<1x1x256xf32> to vector<1x1xf32>
    %13 = vector.broadcast %11 : vector<1x1x256xf32> to vector<1x16x256xf32>
    %14 = arith.mulf %0, %13 : vector<1x16x256xf32>
    %cst_6 = arith.constant dense<0.000000e+00> : vector<1x16xf32>
    %15 = vector.multi_reduction <add>, %14, %cst_6 [2] : vector<1x16x256xf32> to vector<1x16xf32>
    %16 = tpu.reciprocal %12 : vector<1x1xf32> -> vector<1x1xf32>
    %17 = vector.broadcast %16 : vector<1x1xf32> to vector<1x16xf32>
    %18 = arith.mulf %15, %17 : vector<1x16xf32>
    %c0_7 = arith.constant 0 : index
    %c0_8 = arith.constant 0 : index
    %19 = vector.load %arg3[%c0_7, %c0_8] : memref<16x4xf32, #tpu.memory_space<vmem>>, vector<16x4xf32>
    %cst_9 = arith.constant dense<0.000000e+00> : vector<1x4xf32>
    %20 = tpu.matmul %18, %19, %cst_9 {dimension_numbers = #tpu.dot_dimension_numbers<[1], [0], [0], [1], [0, 0, 1, 1], [], []>} : vector<1x16xf32>, vector<16x4xf32>, vector<1x4xf32> -> vector<1x4xf32>
    %c0_10 = arith.constant 0 : index
    %c0_11 = arith.constant 0 : index
    %21 = vector.load %arg4[%c0_10, %c0_11] : memref<1x4xf32, #tpu.memory_space<vmem>>, vector<1x4xf32>
    %22 = arith.addf %20, %21 : vector<1x4xf32>
    %cst_12 = arith.constant dense<0.000000e+00> : vector<1xf32>
    %23 = vector.multi_reduction <add>, %22, %cst_12 [1] : vector<1x4xf32> to vector<1xf32>
    %24 = vector.shape_cast %23 : vector<1xf32> to vector<1x1xf32>
    %cst_13 = arith.constant 4.000000e+00 : f32
    %25 = vector.broadcast %cst_13 : f32 to vector<1x1xf32>
    %26 = arith.divf %24, %25 : vector<1x1xf32>
    %27 = vector.broadcast %26 : vector<1x1xf32> to vector<1x4xf32>
    %28 = arith.subf %22, %27 : vector<1x4xf32>
    %29 = arith.mulf %28, %28 : vector<1x4xf32>
    %cst_14 = arith.constant dense<0.000000e+00> : vector<1xf32>
    %30 = vector.multi_reduction <add>, %29, %cst_14 [1] : vector<1x4xf32> to vector<1xf32>
    %31 = vector.shape_cast %30 : vector<1xf32> to vector<1x1xf32>
    %cst_15 = arith.constant 4.000000e+00 : f32
    %32 = vector.broadcast %cst_15 : f32 to vector<1x1xf32>
    %33 = arith.divf %31, %32 : vector<1x1xf32>
    %34 = vector.broadcast %26 : vector<1x1xf32> to vector<1x4xf32>
    %35 = arith.subf %22, %34 : vector<1x4xf32>
    %cst_16 = arith.constant 9.99999974E-6 : f32
    %36 = vector.broadcast %cst_16 : f32 to vector<1x1xf32>
    %37 = arith.addf %33, %36 : vector<1x1xf32>
    %38 = math.rsqrt %37 : vector<1x1xf32>
    %39 = vector.broadcast %38 : vector<1x1xf32> to vector<1x4xf32>
    %40 = arith.mulf %35, %39 : vector<1x4xf32>
    %c0_17 = arith.constant 0 : index
    %c0_18 = arith.constant 0 : index
    %41 = vector.load %arg5[%c0_17, %c0_18] : memref<1x4xf32, #tpu.memory_space<vmem>>, vector<1x4xf32>
    %42 = arith.mulf %40, %41 : vector<1x4xf32>
    %c0_19 = arith.constant 0 : index
    %c0_20 = arith.constant 0 : index
    %43 = vector.load %arg6[%c0_19, %c0_20] : memref<1x4xf32, #tpu.memory_space<vmem>>, vector<1x4xf32>
    %44 = arith.addf %42, %43 : vector<1x4xf32>
    %cst_21 = arith.constant 0.000000e+00 : f32
    %45 = vector.broadcast %cst_21 : f32 to vector<1x4xf32>
    %46 = arith.maximumf %44, %45 : vector<1x4xf32>
    %c0_22 = arith.constant 0 : index
    %c0_23 = arith.constant 0 : index
    %47 = vector.load %arg7[%c0_22, %c0_23] : memref<4x16xf32, #tpu.memory_space<vmem>>, vector<4x16xf32>
    %cst_24 = arith.constant dense<0.000000e+00> : vector<1x16xf32>
    %48 = tpu.matmul %46, %47, %cst_24 {dimension_numbers = #tpu.dot_dimension_numbers<[1], [0], [0], [1], [0, 0, 1, 1], [], []>} : vector<1x4xf32>, vector<4x16xf32>, vector<1x16xf32> -> vector<1x16xf32>
    %c0_25 = arith.constant 0 : index
    %c0_26 = arith.constant 0 : index
    %49 = vector.load %arg8[%c0_25, %c0_26] : memref<1x16xf32, #tpu.memory_space<vmem>>, vector<1x16xf32>
    %50 = arith.addf %48, %49 : vector<1x16xf32>
    %51 = vector.shape_cast %50 : vector<1x16xf32> to vector<1x16x1xf32>
    %52 = vector.broadcast %51 : vector<1x16x1xf32> to vector<1x16x256xf32>
    %53 = arith.addf %0, %52 : vector<1x16x256xf32>
    %c0_27 = arith.constant 0 : index
    %c0_28 = arith.constant 0 : index
    %c0_29 = arith.constant 0 : index
    %54 = vector.load %arg9[%c0_27, %c0_28, %c0_29] : memref<1x16x256xf32, #tpu.memory_space<vmem>>, vector<1x16x256xf32>
    tpu.vector_store %arg9[%c0_27, %c0_28, %c0_29], %53 {strides = array<i32>} : memref<1x16x256xf32, #tpu.memory_space<vmem>>, vector<1x16x256xf32>,
    return
  }
  func.func @transform_0(%arg0: i32) -> (i32, i32, i32) {
    %c0_i32 = arith.constant 0 : i32
    %c0_i32_0 = arith.constant 0 : i32
    %c0_i32_1 = arith.constant 0 : i32
    return %arg0, %c0_i32, %c0_i32_0 : i32, i32, i32
  }
  func.func @transform_1(%arg0: i32) -> (i32, i32) {
    %c0_i32 = arith.constant 0 : i32
    %c0_i32_0 = arith.constant 0 : i32
    %c0_i32_1 = arith.constant 0 : i32
    return %c0_i32, %c0_i32_0 : i32, i32
  }
  func.func @transform_2(%arg0: i32) -> (i32, i32) {
    %c0_i32 = arith.constant 0 : i32
    %c0_i32_0 = arith.constant 0 : i32
    %c0_i32_1 = arith.constant 0 : i32
    return %c0_i32, %c0_i32_0 : i32, i32
  }
  func.func @transform_3(%arg0: i32) -> (i32, i32) {
    %c0_i32 = arith.constant 0 : i32
    %c0_i32_0 = arith.constant 0 : i32
    %c0_i32_1 = arith.constant 0 : i32
    return %c0_i32, %c0_i32_0 : i32, i32
  }
  func.func @transform_4(%arg0: i32) -> (i32, i32) {
    %c0_i32 = arith.constant 0 : i32
    %c0_i32_0 = arith.constant 0 : i32
    %c0_i32_1 = arith.constant 0 : i32
    return %c0_i32, %c0_i32_0 : i32, i32
  }
  func.func @transform_5(%arg0: i32) -> (i32, i32) {
    %c0_i32 = arith.constant 0 : i32
    %c0_i32_0 = arith.constant 0 : i32
    %c0_i32_1 = arith.constant 0 : i32
    return %c0_i32, %c0_i32_0 : i32, i32
  }
  func.func @transform_6(%arg0: i32) -> (i32, i32) {
    %c0_i32 = arith.constant 0 : i32
    %c0_i32_0 = arith.constant 0 : i32
    %c0_i32_1 = arith.constant 0 : i32
    return %c0_i32, %c0_i32_0 : i32, i32
  }
  func.func @transform_7(%arg0: i32) -> (i32, i32) {
    %c0_i32 = arith.constant 0 : i32
    %c0_i32_0 = arith.constant 0 : i32
    %c0_i32_1 = arith.constant 0 : i32
    return %c0_i32, %c0_i32_0 : i32, i32
  }
  func.func @transform_8(%arg0: i32) -> (i32, i32, i32) {
    %c0_i32 = arith.constant 0 : i32
    %c0_i32_0 = arith.constant 0 : i32
    %c0_i32_1 = arith.constant 0 : i32
    return %arg0, %c0_i32, %c0_i32_0 : i32, i32, i32
  }
}

</mosaic_0001>

<bundles_post_ra>
// kernel: _gc_block_impl.1
= control target key start
LH: loop header
LB: loop body
LE: loop exit
PB: predicated region body
PF: predicated region fallthrough
CT: control target
= control target key end

     0   :  { %s742_s27 = smov 0   ;;  %s810_s0 = inlined_call_operand.vmem [shape: f32[4,16,256], index: 0, kind: input, shape index: {}, may-alias: {0,8}]   ;;  %s811_s1 = inlined_call_operand.vmem [shape: f32[1,16], index: 1, kind: input, shape index: {}]   ;;  %s812_s2 = inlined_call_operand.vmem [shape: f32[16,4], index: 2, kind: input, shape index: {}]   ;;  %s813_s3 = inlined_call_operand.vmem [shape: f32[1,4], index: 3, kind: input, shape index: {}]   ;;  %s814_s4 = inlined_call_operand.vmem [shape: f32[1,4], index: 4, kind: input, shape index: {}]   ;;  %s815_s5 = inlined_call_operand.vmem [shape: f32[1,4], index: 5, kind: input, shape index: {}]   ;;  %s816_s6 = inlined_call_operand.vmem [shape: f32[4,16], index: 6, kind: input, shape index: {}]   ;;  %s817_s7 = inlined_call_operand.vmem [shape: f32[1,16], index: 7, kind: input, shape index: {}]   ;;  %s818_s8 = inlined_call_operand.vmem [shape: f32[4,16,256], index: 8, kind: output, shape index: {}, may-alias: {0,8}]  }
   0x1 LB: > { %s630_s28 = sadd.s32 4294967295, %s692_s27   ;;  %p634_p0 = scmp.ge.s32.totalorder %s692_s27, 1  ;;  %s692_s27 = sphi %s742_s27, %s18_s27  }
   0x2   : > { %p262_p1 = scmp.lt.s32.totalorder %s692_s27, 5 }
   0x4   : > { %p263_p2 = pnand %p634_p0, %p262_p1 }
   0x5   : > { %v639_v0 = vld [vmem:[%s811_s1] ss:$0 sm:$0xff] (!%p263_p2)  ;;  %p296_p3 = scmp.lt.s32.totalorder (!%p263_p2), %s630_s28, 3  ;;  %v366_v41 = vld [vmem:[%s812_s2 + $0x8] sm:$0xff] (!%p263_p2)  ;;  %v694_v43 = vmov (!%p263_p2), 0.0|0.0   ;;  %vm695_vm0 = vmmov (!%p263_p2), 0   ;;  %v370_v45 = vlaneseq (!%p263_p2) }
   0x6   : > { %266 = sbr.rel (%p263_p2) target bundleno = 1328 (0x530), region = 52  ;;  %316 = vbcast.lane.b32.xlu0 (!%p263_p2), %v639_v0, 256  ;;  %v365_v40 = vld [vmem:[%s812_s2] sm:$0xff] (!%p263_p2)  ;;  %664 = vmatprep.subr.bf16.mxu0 (!%p263_p2), %v694_v43  ;;  %v696_v44 = vmov (!%p263_p2), 0.0   ;;  %vm381_vm1 = vcmask (!%p263_p2), 130112   ;;  %vm383_vm2 = vcmask (!%p263_p2), 130048  }
   0x7   : > { %v665_v42 = vpack.c.bf16 (!%p263_p2), %v366_v41, %v365_v40  ;;  %656 = vmatprep.mubr.msk.f32.mxu0 (!%p263_p2), %vm695_vm0, %v696_v44  ;;  %659 = vmatprep.subr.mxu1 (!%p263_p2), %v696_v44  ;;  %v371_v47 = vand.u32 (!%p263_p2), 127, %v370_v45  ;;  %v373_v48 = vshrl.u32 (!%p263_p2), %v370_v45, 7  ;;  %v367_v60 = vld [vmem:[%s813_s3] sm:$0x1] (!%p263_p2)  ;;  %vm456_vm3 = vcmask (!%p263_p2), 24576  }
   0x8   : > { %661 = vmatprep.mubr.msk.f32.mxu1 (!%p263_p2), %vm695_vm0, %v696_v44  ;;  %vm482_vm4 = vcmask (!%p263_p2), 1043456   ;;  %vm478_vm5 = vcmask (!%p263_p2), 31744  }
   0x9   : > { %666 = vmatpush3.bf16.msra.mxu0 (!%p263_p2), %v665_v42  ;;  %v376_v49 = vadd.s32 (!%p263_p2), 4294967288, %v371_v47  ;;  %v374_v50 = vsub.s32 (!%p263_p2), %v371_v47, %v373_v48 }
   0xa   : > { %320 = vbcast.lane.b32.xlu0 (!%p263_p2), %v639_v0, 264 }
   0xb   : > { %v379_v51 = vsub.s32 (!%p263_p2), %v376_v49, %v373_v48 }
   0xd   : > { %s820_s28 = smov (!%p296_p3, %s630_s28), 3 }
   0xe   : > { %s645_s9 = sshll.u32 %s820_s28, 5 }
   0xf   : > { %s300_s12 = scalar_lea.vmem %s810_s0, %s645_s9  ;;  %s305_s10 = scalar_lea.vmem %s818_s8, %s645_s9 }
  0x10   : > { %v761_v2 = vld [vmem:[%s300_s12] sm:$0xff]  ;;  %v763_v3 = vld [vmem:[%s300_s12 + $0x8] sm:$0xff]  ;;  %v765_v4 = vld [vmem:[%s300_s12 + $0x10] sm:$0xff] }
  0x11   : > { %v767_v5 = vld [vmem:[%s300_s12 + $0x18] sm:$0xff] }
  0x78   : > { %v317_v1 = vpop.permute.xlu0 %316 }
  0x79   : > { %v322_v7 = vmul.f32 %v317_v1, %v761_v2  ;;  %v323_v8 = vmul.f32 %v317_v1, %v763_v3 }
  0x7c   : > { %v321_v6 = vpop.permute.xlu0 %320 }
  0x7d   : > { %v324_v9 = vmul.f32 %v321_v6, %v765_v4  ;;  %v325_v10 = vmul.f32 %v321_v6, %v767_v5 }
  0x7f   : > { %v326_v11 = vadd.f32 %v324_v9, %v322_v7  ;;  %v333_v12 = vadd.f32 %v325_v10, %v323_v8  ;;  %v476_v10 = vld [vmem:[%s816_s6] sm:$0xf] }
  0x80   : > { %660 = vmatpush3.msk.msra.mxu1 %vm482_vm4, %v476_v10 }
  0x81   : > { %v327_v13 = vrot.slane %v326_v11, 4  ;;  %v334_v14 = vrot.slane %v333_v12, 4 }
  0x83   : > { %v328_v15 = vadd.f32 %v327_v13, %v326_v11  ;;  %v335_v16 = vadd.f32 %v334_v14, %v333_v12 }
  0x85   : > { %v329_v17 = vrot.slane %v328_v15, 2  ;;  %v336_v18 = vrot.slane %v335_v16, 2 }
  0x87   : > { %v330_v19 = vadd.f32 %v329_v17, %v328_v15  ;;  %v337_v20 = vadd.f32 %v336_v18, %v335_v16  ;;  %v471_v15 = vld [vmem:[%s814_s4] sm:$0x1] }
  0x88   : > { %v473_v17 = vld [vmem:[%s815_s5] sm:$0x1] }
  0x89   : > { %v331_v21 = vrot.slane %v330_v19, 1  ;;  %v338_v22 = vrot.slane %v337_v20, 1 }
  0x8b   : > { %v332_v23 = vadd.f32 %v331_v21, %v330_v19  ;;  %v339_v24 = vadd.f32 %v338_v22, %v337_v20  ;;  %v477_v21 = vld [vmem:[%s817_s7] sm:$0x1]  ;;  %v558_v22 = vsub.s32 0, %v373_v48 }
  0x8d   : > { %v340_v25 = vmax.f32 %v332_v23, %v339_v24 }
  0x8f   : > { %341 = vmax.xlane.f32.xlu1 %v340_v25 }
 0x11c   : > { %v342_v26 = vpop.xlane.xlu1 %341 }
 0x11d   : > { %v343_v27 = vsub.f32 %v332_v23, %v342_v26  ;;  %v344_v28 = vsub.f32 %v339_v24, %v342_v26 }
 0x11f   : > { %v345_v29 = vmul.f32 1.442695, %v343_v27  ;;  %v347_v30 = vmul.f32 1.442695, %v344_v28 }
 0x121   : > { %678 = vpow2.f32 %v345_v29 }
 0x122   : > { %680 = vpow2.f32 %v347_v30 }
 0x12b   : > { %v679_v31 = vpop.eup %678 }
 0x12c   : > { %v681_v32 = vpop.eup %680  ;;  %v352_v33 = vmul.f32 %v679_v31, %v761_v2  ;;  %v354_v36 = vmul.f32 %v679_v31, %v765_v4 }
 0x12d   : > { %v349_v34 = vadd.f32 %v681_v32, %v679_v31  ;;  %v353_v35 = vmul.f32 %v681_v32, %v763_v3  ;;  %v355_v37 = vmul.f32 %v681_v32, %v767_v5 }
 0x12f   : > { %350 = vadd.xlane.f32.xlu1 %v349_v34  ;;  %v356_v38 = vadd.f32 %v353_v35, %v352_v33  ;;  %v359_v39 = vadd.f32 %v355_v37, %v354_v36 }
 0x131   : > { %357 = vadd.xlane.f32.xlu0 %v356_v38 }
 0x133   : > { %360 = vadd.xlane.f32.xlu1 %v359_v39 }
 0x1bc   : > { %v351_v46 = vpop.xlane.xlu1 %350 }
 0x1bd   : > { %682 = vrcp.f32 %v351_v46 }
 0x1be   : > { %v358_v53 = vpop.xlane.xlu0 %357 }
 0x1c0   : > { %v361_v54 = vpop.xlane.xlu1 %360 }
 0x1c7   : > { %v683_v52 = vpop.eup %682 }
 0x1c8   : > { %v363_v55 = vmul.f32 %v683_v52, %v358_v53  ;;  %v364_v56 = vmul.f32 %v683_v52, %v361_v54 }
 0x1ca   : > { %v375_v57 = vrot.slane %v363_v55, %v374_v50  ;;  %v380_v58 = vrot.slane %v364_v56, %v379_v51 }
 0x1cc   : > { %v382_v59 = vsel %vm381_vm1, %v380_v58, %v375_v57 }
 0x1cd   : > { %657 = vmatmul.mubr.msk.f32.vlgmr.msra.gmra.mrb[0].mxu0 %vm383_vm2, %v382_v59 }
 0x2a0   : > { %v452_v61 = vpop.f32.mrb[0].mxu0 }
 0x2a1   : > { %v453_v62 = vadd.f32 %v452_v61, %v367_v60  ;;  %v658_v63 = vpop.f32.mrb[1].mxu0 }
 0x2a3   : > { %v457_v0 = vsel %vm456_vm3, %v453_v62, 0.0 }
 0x2a4   : > { %458 = vadd.xlane.f32.xlu1 %v457_v0 }
 0x331   : > { %v459_v1 = vpop.xlane.xlu1 %458 }
 0x332   : > { %v461_v6 = vmul.f32 0.25, %v459_v1 }
 0x334   : > { %v462_v7 = vsub.f32 %v453_v62, %v461_v6 }
 0x336   : > { %v463_v8 = vmul.f32 %v462_v7, %v462_v7 }
 0x338   : > { %v464_v9 = vsel %vm456_vm3, %v463_v8, 0.0 }
 0x339   : > { %465 = vadd.xlane.f32.xlu1 %v464_v9 }
 0x3c6   : > { %v466_v11 = vpop.xlane.xlu1 %465 }
 0x3c7   : > { %v467_v12 = vmul.f32 0.25, %v466_v11 }
 0x3c9   : > { %v468_v13 = vadd.f32 1e-05, %v467_v12 }
 0x3cb   : > { %684 = vrsqrt.f32 %v468_v13 }
 0x3d5   : > { %v685_v14 = vpop.eup %684 }
 0x3d6   : > { %v470_v16 = vmul.f32 %v685_v14, %v462_v7 }
 0x3d8   : > { %v472_v18 = vmul.f32 %v471_v15, %v470_v16 }
 0x3da   : > { %v474_v19 = vadd.f32 %v473_v17, %v472_v18 }
 0x3dc   : > { %v475_v20 = vmax.f32 %v474_v19, 0.0 }
 0x3de   : > { %662 = vmatmul.mubr.msk.f32.vlgmr.msra.gmra.mrb[0].mxu1 %vm478_vm5, %v475_v20 }
 0x4b1   : > { %v552_v23 = vpop.f32.mrb[0].mxu1 }
 0x4b2   : > { %v553_v24 = vadd.f32 %v552_v23, %v477_v21  ;;  %v663_v25 = vpop.f32.mrb[1].mxu1 }
 0x4b4   : > { %v559_v26 = vrot.slane %v553_v24, %v558_v22 }
 0x4b6   : > { %561 = vbcast.lane.b32.xlu1 %v559_v26, 256 }
 0x4ba   : > { %565 = vbcast.lane.b32.xlu1 %v559_v26, 264 }
 0x528   : > { %v562_v27 = vpop.permute.xlu1 %561 }
 0x529   : > { %v567_v28 = vadd.f32 %v562_v27, %v761_v2  ;;  %v568_v29 = vadd.f32 %v562_v27, %v763_v3 }
 0x52b   : > { %571 = vst [vmem:[%s305_s10] sm:$0xff] %v567_v28  ;;  %572 = vst [vmem:[%s305_s10 + $0x8] sm:$0xff] %v568_v29 }
 0x52c   : > { %v566_v30 = vpop.permute.xlu1 %565 }
 0x52d   : > { %v569_v31 = vadd.f32 %v566_v30, %v765_v4  ;;  %v570_v32 = vadd.f32 %v566_v30, %v767_v5 }
 0x52f   : > { %573 = vst [vmem:[%s305_s10 + $0x10] sm:$0xff] %v569_v31  ;;  %574 = vst [vmem:[%s305_s10 + $0x18] sm:$0xff] %v570_v32 }
 0x530 PF: > { %s18_s27 = sadd.s32 1, %s692_s27  }
 0x531   : > { %p15_p4 = scmp.ge.s32.totalorder %s18_s27, 6  }
 0x533   :  { %17 = sbr.rel (!%p15_p4) target bundleno = 1 (0x1), region = 82 }

</bundles_post_ra>
